<compile_context>
chip_gen: v5e
topology: v5e:2x2
jax: 0.10.0
libtpu: 0.0.40
codegen_flags: <defaults>
</compile_context>

<pallas_src>
import jax
import jax.numpy as jnp
from jax import lax
from jax.experimental import pallas as pl
from jax.experimental.pallas import tpu as pltpu

POOL = 13          # MaxPool1d(13, 13)
COS_EPS = 1e-8     # nn.CosineSimilarity default eps


def fused_cnn_cosine_kernel(idsR_ref, embT_ref, w_ref, out_ref):
    """Fused Embedding-gather -> view(B,D,L) -> Conv1d -> ReLU -> MaxPool -> Cosine.

    idsR_ref : (2B*q, 1, C) int32  permuted token ids, idsR[n*q+u, 0, c] = ids[n, c*q+u]
    embT_ref : (D, V)       f32    transposed embedding table, embT[d, v] = emb[v, d]
    w_ref    : (K, C, C)    bf16   conv weight, w[k, c, o] = W[o, c, k]
    out_ref  : (1, B)       f32    cosine scores, batch on the lane axis
    """
    N2q, _, C = idsR_ref.shape
    D, V = embT_ref.shape
    K = w_ref.shape[0]
    B = out_ref.shape[1]
    N2 = 2 * B
    q = N2q // N2
    L = q * D
    # Rows the max-pool actually consumes (P == 1 is asserted in the wrapper).
    T = ((L - K + 1) // POOL) * POOL

    # ---- 1) Embedding gather + .view(B,D,L) + transpose as ONE one-hot MXU matmul.
    # g[nq, d, c] = emb_table[idsR[nq, 0, c], d]  ==  xT[n, u*D+d, c]  (nq = n*q+u)
    ids_b = jnp.broadcast_to(idsR_ref[...], (N2q, V, C))            # sublane broadcast
    v_iota = lax.broadcasted_iota(jnp.int32, (N2q, V, C), 1)
    onehot = (v_iota == ids_b).astype(jnp.float32)                  # (2Bq, V, C)
    embT_b = jnp.broadcast_to(embT_ref[...], (N2q, D, V))           # add leading batch dim
    g = jnp.einsum('bdv,bvc->bdc', embT_b, onehot,
                   preferred_element_type=jnp.float32)              # (2Bq, D, C), exact f32
    xT = g.reshape(N2, L, C)                                        # time-major x; lane = channels
                                                                    # (leading-dim regroup only)

    # ---- 2) Conv1d(no bias) = K accumulating shifted batched matmuls (bf16 -> f32 acc),
    #         restricted to the T rows the pool consumes (skips the discarded tail rows).
    def tap(k):
        lhs = xT[:, k:k + T, :].astype(jnp.bfloat16)                # (2B, T, C)
        rhs = jnp.broadcast_to(w_ref[k], (N2, C, C))                # (2B, C, C) bf16
        return jnp.einsum('btc,bco->bto', lhs, rhs,
                          preferred_element_type=jnp.float32)       # (2B, T, C) f32

    acc = tap(0)
    for k in range(1, K):                                           # static K
        acc = acc + tap(k)

    # ---- 3) ReLU + MaxPool1d(13, 13).  P == 1 here, so a single max over the T rows.
    # TODO(synk): for P > 1 reshape to (2B, P, POOL, C) and max over axis 2.
    pooled = jnp.max(jnp.maximum(acc, 0.0), axis=1)                 # (2B, C)

    # ---- 4) CosineSimilarity over channels; lane-dense (1, B) result.
    # Cross-channel sums are tiny nt-matmuls against a ones row so the batch index
    # lands on the lane axis of the output (single unmasked-style row store).
    p1 = pooled[:B]                                                 # (B, C)
    p2 = pooled[B:]
    ones_row = jnp.ones((1, C), jnp.float32)
    num_row = jnp.einsum('oc,bc->ob', ones_row, p1 * p2,
                         preferred_element_type=jnp.float32)        # (1, B)
    sq_row = jnp.einsum('oc,bc->ob', ones_row, pooled * pooled,
                        preferred_element_type=jnp.float32)         # (1, 2B)
    eps2 = COS_EPS * COS_EPS
    inv1 = lax.rsqrt(jnp.maximum(sq_row[:, :B], eps2))              # per-factor clamp (ATen)
    inv2 = lax.rsqrt(jnp.maximum(sq_row[:, B:], eps2))
    out_ref[...] = num_row * inv1 * inv2                            # one (1, B) store


def model_forward(ids1, ids2, emb_table, conv_w):
    """ids*: (B, L) int32; emb_table: (V, D); conv_w: (D, D, K) (PyTorch Conv1d layout)."""
    B, L = ids1.shape
    V, D = emb_table.shape
    C = D
    K = conv_w.shape[-1]
    L_out = L - K + 1
    P = L_out // POOL
    assert P == 1, "score.view(B) in the reference model requires pooled length == 1"
    assert L % D == 0, "the fused .view(B, D, L) gather below assumes voc_dim | seq_len"
    q = L // D
    N2 = 2 * B
    T = P * POOL

    # ---- Tiny integer / parameter glue (no activation tensors touch HBM). ----------
    ids_all = jnp.concatenate([ids1, ids2], axis=0).astype(jnp.int32)        # (2B, L)
    # idsR[n*q + u, 0, c] = ids_all[n, c*q + u]  -- folds the PyTorch .view(B, D, L)
    # reinterpretation + time-major transpose into a pure index permutation.
    idsR = jnp.transpose(ids_all.reshape(N2, C, q), (0, 2, 1)).reshape(N2 * q, 1, C)
    embT = jnp.transpose(emb_table).astype(jnp.float32)                      # (D, V)
    w_stack = jnp.transpose(conv_w, (2, 1, 0)).astype(jnp.bfloat16)          # (K, C, C)

    cost = pl.CostEstimate(
        flops=2 * N2 * q * D * V * C          # one-hot gather matmul
              + 2 * N2 * T * C * C * K        # conv taps
              + 2 * C * (B + N2),             # cosine reductions
        transcendentals=2 * B,                # two rsqrt per batch element
        bytes_accessed=idsR.size * 4 + embT.size * 4 + w_stack.size * 2 + B * 4)

    out = pl.pallas_call(
        fused_cnn_cosine_kernel,
        out_shape=jax.ShapeDtypeStruct((1, B), jnp.float32),
        grid=(1,),
        in_specs=[
            pl.BlockSpec((N2 * q, 1, C), lambda i: (0, 0, 0)),
            pl.BlockSpec((D, V), lambda i: (0, 0)),
            pl.BlockSpec((K, C, C), lambda i: (0, 0, 0)),
        ],
        out_specs=pl.BlockSpec((1, B), lambda i: (0, 0)),
        compiler_params=pltpu.CompilerParams(dimension_semantics=("arbitrary",)),
        cost_estimate=cost,
    )(idsR, embT, w_stack)

    return out.reshape(B)                                            # == score.view(B)


def reference_forward(ids1, ids2, emb_table, conv_w):
    """Pure-JAX (f32) reference for a correctness check."""
    B, L = ids1.shape
    V, D = emb_table.shape
    x1 = jnp.take(emb_table, ids1, axis=0).reshape(B, D, L).astype(jnp.float32)
    x2 = jnp.take(emb_table, ids2, axis=0).reshape(B, D, L).astype(jnp.float32)

    def cnn(x):
        y = lax.conv_general_dilated(
            x, conv_w.astype(jnp.float32), (1,), "VALID",
            dimension_numbers=("NCH", "OIH", "NCH"))
        y = jnp.maximum(y, 0.0)
        L_out = y.shape[-1]
        P = L_out // POOL
        return y[..., : P * POOL].reshape(B, D, P, POOL).max(-1)

    c1, c2 = cnn(x1), cnn(x2)
    num = jnp.sum(c1 * c2, axis=1)
    den = jnp.maximum(jnp.linalg.norm(c1, axis=1) * jnp.linalg.norm(c2, axis=1), COS_EPS)
    return (num / den).reshape(B)


if __name__ == "__main__":
    # Config consistent with the module: kernel_size=3, voc_size=32, voc_dim=8,
    # batch=2, seq_len=16  ->  conv out len 14, MaxPool1d(13,13) out len 1.
    kernel_size, voc_size, voc_dim = 3, 32, 8
    batch, seq_len = 2, 16

    key = jax.random.PRNGKey(0)
    k_emb, k_w, k_i1, k_i2 = jax.random.split(key, 4)

    emb_table = jax.random.normal(k_emb, (voc_size, voc_dim), dtype=jnp.float32)
    fan = voc_dim * kernel_size + voc_dim
    conv_w = jax.random.normal(k_w, (voc_dim, voc_dim, kernel_size), dtype=jnp.float32)
    conv_w = conv_w * jnp.sqrt(2.0 / fan)

    input_1 = jax.random.randint(k_i1, (batch, seq_len), 0, voc_size, dtype=jnp.int32)
    input_2 = jax.random.randint(k_i2, (batch, seq_len), 0, voc_size, dtype=jnp.int32)

    score = jax.block_until_ready(model_forward(input_1, input_2, emb_table, conv_w))
    ref = jax.block_until_ready(reference_forward(input_1, input_2, emb_table, conv_w))

    assert score.shape == (batch,), score.shape
    # 2e-2 tolerance: the kernel uses bf16 conv-matmul operands (f32 accumulation),
    # the reference is pure f32; expected deviation is well under 1%.
    assert jnp.allclose(score, ref, atol=2e-2, rtol=2e-2), (score, ref)
    print("KERNEL_OK")
</pallas_src>

<mosaic_0001>
module attributes {stable_mosaic.version = 11 : i64} {
  func.func @fused_cnn_cosine_kernel(%arg0: i32, %arg1: memref<8x1x8xi32, #tpu.memory_space<vmem>>, %arg2: memref<8x32xf32, #tpu.memory_space<vmem>>, %arg3: memref<3x8x8xbf16, #tpu.memory_space<vmem>>, %arg4: memref<1x2xf32, #tpu.memory_space<vmem>>) attributes {dimension_semantics = [#tpu.dimension_semantics<arbitrary>], iteration_bounds = array<i64: 1>, scalar_prefetch = 0 : i64, scratch_operands = 0 : i64, tpu.core_type = #tpu.core_type<tc>, window_params = [{pipeline_mode = #tpu.pipeline_mode<synchronous>, transform_indices = @transform_0, window_bounds = array<i64: 8, 1, 8>}, {pipeline_mode = #tpu.pipeline_mode<synchronous>, transform_indices = @transform_1, window_bounds = array<i64: 8, 32>}, {pipeline_mode = #tpu.pipeline_mode<synchronous>, transform_indices = @transform_2, window_bounds = array<i64: 3, 8, 8>}, {pipeline_mode = #tpu.pipeline_mode<synchronous>, transform_indices = @transform_3, window_bounds = array<i64: 1, 2>}]} {
    %c0 = arith.constant 0 : index
    %c0_0 = arith.constant 0 : index
    %c0_1 = arith.constant 0 : index
    %0 = vector.load %arg1[%c0, %c0_0, %c0_1] : memref<8x1x8xi32, #tpu.memory_space<vmem>>, vector<8x1x8xi32>
    %1 = vector.shape_cast %0 : vector<8x1x8xi32> to vector<8x1x8xi32>
    %2 = vector.broadcast %1 : vector<8x1x8xi32> to vector<8x32x8xi32>
    %3 = tpu.iota {dimensions = array<i32: 1>} : vector<8x32x8xi32>
    %4 = arith.cmpi eq, %3, %2 : vector<8x32x8xi32>
    %5 = arith.extui %4 : vector<8x32x8xi1> to vector<8x32x8xi32>
    %6 = arith.sitofp %5 : vector<8x32x8xi32> to vector<8x32x8xf32>
    %c0_2 = arith.constant 0 : index
    %c0_3 = arith.constant 0 : index
    %7 = vector.load %arg2[%c0_2, %c0_3] : memref<8x32xf32, #tpu.memory_space<vmem>>, vector<8x32xf32>
    %8 = vector.shape_cast %7 : vector<8x32xf32> to vector<1x8x32xf32>
    %9 = vector.broadcast %8 : vector<1x8x32xf32> to vector<8x8x32xf32>
    "tpu.trace_start"() <{level = 10 : i32, message = "bdv,bvc->bdc"}> : () -> ()
    %cst = arith.constant dense<0.000000e+00> : vector<8x8x8xf32>
    %10 = tpu.matmul %9, %6, %cst {dimension_numbers = #tpu.dot_dimension_numbers<[2], [1], [1], [2], [0, 0, 0, 1, 1, 2], [0], [0]>} : vector<8x8x32xf32>, vector<8x32x8xf32>, vector<8x8x8xf32> -> vector<8x8x8xf32>
    "tpu.trace_stop"() : () -> ()
    %11 = vector.shape_cast %10 : vector<8x8x8xf32> to vector<4x16x8xf32>
    %12 = vector.extract_strided_slice %11 {offsets = [0, 0, 0], sizes = [4, 13, 8], strides = [1, 1, 1]} : vector<4x16x8xf32> to vector<4x13x8xf32>
    %13 = arith.truncf %12 : vector<4x13x8xf32> to vector<4x13x8xbf16>
    %c0_4 = arith.constant 0 : index
    %c0_5 = arith.constant 0 : index
    %c0_6 = arith.constant 0 : index
    %14 = vector.load %arg3[%c0_4, %c0_5, %c0_6] : memref<3x8x8xbf16, #tpu.memory_space<vmem>>, vector<1x8x8xbf16>
    %15 = vector.shape_cast %14 : vector<1x8x8xbf16> to vector<8x8xbf16>
    %16 = vector.shape_cast %15 : vector<8x8xbf16> to vector<1x8x8xbf16>
    %17 = vector.broadcast %16 : vector<1x8x8xbf16> to vector<4x8x8xbf16>
    "tpu.trace_start"() <{level = 10 : i32, message = "btc,bco->bto"}> : () -> ()
    %cst_7 = arith.constant dense<0.000000e+00> : vector<4x13x8xf32>
    %18 = tpu.matmul %13, %17, %cst_7 {dimension_numbers = #tpu.dot_dimension_numbers<[2], [1], [1], [2], [0, 0, 0, 1, 1, 2], [0], [0]>} : vector<4x13x8xbf16>, vector<4x8x8xbf16>, vector<4x13x8xf32> -> vector<4x13x8xf32>
    "tpu.trace_stop"() : () -> ()
    %19 = vector.extract_strided_slice %11 {offsets = [0, 1, 0], sizes = [4, 13, 8], strides = [1, 1, 1]} : vector<4x16x8xf32> to vector<4x13x8xf32>
    %20 = arith.truncf %19 : vector<4x13x8xf32> to vector<4x13x8xbf16>
    %c1 = arith.constant 1 : index
    %c0_8 = arith.constant 0 : index
    %c0_9 = arith.constant 0 : index
    %21 = vector.load %arg3[%c1, %c0_8, %c0_9] : memref<3x8x8xbf16, #tpu.memory_space<vmem>>, vector<1x8x8xbf16>
    %22 = vector.shape_cast %21 : vector<1x8x8xbf16> to vector<8x8xbf16>
    %23 = vector.shape_cast %22 : vector<8x8xbf16> to vector<1x8x8xbf16>
    %24 = vector.broadcast %23 : vector<1x8x8xbf16> to vector<4x8x8xbf16>
    "tpu.trace_start"() <{level = 10 : i32, message = "btc,bco->bto"}> : () -> ()
    %cst_10 = arith.constant dense<0.000000e+00> : vector<4x13x8xf32>
    %25 = tpu.matmul %20, %24, %cst_10 {dimension_numbers = #tpu.dot_dimension_numbers<[2], [1], [1], [2], [0, 0, 0, 1, 1, 2], [0], [0]>} : vector<4x13x8xbf16>, vector<4x8x8xbf16>, vector<4x13x8xf32> -> vector<4x13x8xf32>
    "tpu.trace_stop"() : () -> ()
    %26 = arith.addf %18, %25 : vector<4x13x8xf32>
    %27 = vector.extract_strided_slice %11 {offsets = [0, 2, 0], sizes = [4, 13, 8], strides = [1, 1, 1]} : vector<4x16x8xf32> to vector<4x13x8xf32>
    %28 = arith.truncf %27 : vector<4x13x8xf32> to vector<4x13x8xbf16>
    %c2 = arith.constant 2 : index
    %c0_11 = arith.constant 0 : index
    %c0_12 = arith.constant 0 : index
    %29 = vector.load %arg3[%c2, %c0_11, %c0_12] : memref<3x8x8xbf16, #tpu.memory_space<vmem>>, vector<1x8x8xbf16>
    %30 = vector.shape_cast %29 : vector<1x8x8xbf16> to vector<8x8xbf16>
    %31 = vector.shape_cast %30 : vector<8x8xbf16> to vector<1x8x8xbf16>
    %32 = vector.broadcast %31 : vector<1x8x8xbf16> to vector<4x8x8xbf16>
    "tpu.trace_start"() <{level = 10 : i32, message = "btc,bco->bto"}> : () -> ()
    %cst_13 = arith.constant dense<0.000000e+00> : vector<4x13x8xf32>
    %33 = tpu.matmul %28, %32, %cst_13 {dimension_numbers = #tpu.dot_dimension_numbers<[2], [1], [1], [2], [0, 0, 0, 1, 1, 2], [0], [0]>} : vector<4x13x8xbf16>, vector<4x8x8xbf16>, vector<4x13x8xf32> -> vector<4x13x8xf32>
    "tpu.trace_stop"() : () -> ()
    %34 = arith.addf %26, %33 : vector<4x13x8xf32>
    %cst_14 = arith.constant 0.000000e+00 : f32
    %35 = vector.broadcast %cst_14 : f32 to vector<4x13x8xf32>
    %36 = arith.maximumf %34, %35 : vector<4x13x8xf32>
    %cst_15 = arith.constant dense<0xFF800000> : vector<4x8xf32>
    %37 = vector.multi_reduction <maximumf>, %36, %cst_15 [1] : vector<4x13x8xf32> to vector<4x8xf32>
    %38 = vector.extract_strided_slice %37 {offsets = [0, 0], sizes = [2, 8], strides = [1, 1]} : vector<4x8xf32> to vector<2x8xf32>
    %39 = vector.extract_strided_slice %37 {offsets = [2, 0], sizes = [2, 8], strides = [1, 1]} : vector<4x8xf32> to vector<2x8xf32>
    %cst_16 = arith.constant 1.000000e+00 : f32
    %40 = vector.broadcast %cst_16 : f32 to vector<1x8xf32>
    %41 = arith.mulf %38, %39 : vector<2x8xf32>
    "tpu.trace_start"() <{level = 10 : i32, message = "oc,bc->ob"}> : () -> ()
    %cst_17 = arith.constant dense<0.000000e+00> : vector<1x2xf32>
    %42 = tpu.matmul %40, %41, %cst_17 {dimension_numbers = #tpu.dot_dimension_numbers<[1], [1], [0], [0], [0, 0, 1, 0], [], []>} : vector<1x8xf32>, vector<2x8xf32>, vector<1x2xf32> -> vector<1x2xf32>
    "tpu.trace_stop"() : () -> ()
    %43 = arith.mulf %37, %37 : vector<4x8xf32>
    "tpu.trace_start"() <{level = 10 : i32, message = "oc,bc->ob"}> : () -> ()
    %cst_18 = arith.constant dense<0.000000e+00> : vector<1x4xf32>
    %44 = tpu.matmul %40, %43, %cst_18 {dimension_numbers = #tpu.dot_dimension_numbers<[1], [1], [0], [0], [0, 0, 1, 0], [], []>} : vector<1x8xf32>, vector<4x8xf32>, vector<1x4xf32> -> vector<1x4xf32>
    "tpu.trace_stop"() : () -> ()
    %45 = vector.extract_strided_slice %44 {offsets = [0, 0], sizes = [1, 2], strides = [1, 1]} : vector<1x4xf32> to vector<1x2xf32>
    %cst_19 = arith.constant 1.000000e-16 : f32
    %46 = vector.broadcast %cst_19 : f32 to vector<1x2xf32>
    %47 = arith.maximumf %45, %46 : vector<1x2xf32>
    %48 = math.rsqrt %47 : vector<1x2xf32>
    %49 = vector.extract_strided_slice %44 {offsets = [0, 2], sizes = [1, 2], strides = [1, 1]} : vector<1x4xf32> to vector<1x2xf32>
    %cst_20 = arith.constant 1.000000e-16 : f32
    %50 = vector.broadcast %cst_20 : f32 to vector<1x2xf32>
    %51 = arith.maximumf %49, %50 : vector<1x2xf32>
    %52 = math.rsqrt %51 : vector<1x2xf32>
    %53 = arith.mulf %42, %48 : vector<1x2xf32>
    %54 = arith.mulf %53, %52 : vector<1x2xf32>
    %c0_21 = arith.constant 0 : index
    %c0_22 = arith.constant 0 : index
    %55 = vector.load %arg4[%c0_21, %c0_22] : memref<1x2xf32, #tpu.memory_space<vmem>>, vector<1x2xf32>
    tpu.vector_store %arg4[%c0_21, %c0_22], %54 {strides = array<i32>} : memref<1x2xf32, #tpu.memory_space<vmem>>, vector<1x2xf32>,
    return
  }
  func.func @transform_0(%arg0: i32) -> (i32, i32, i32) {
    %c0_i32 = arith.constant 0 : i32
    %c0_i32_0 = arith.constant 0 : i32
    %c0_i32_1 = arith.constant 0 : i32
    %c0_i32_2 = arith.constant 0 : i32
    return %c0_i32, %c0_i32_0, %c0_i32_1 : i32, i32, i32
  }
  func.func @transform_1(%arg0: i32) -> (i32, i32) {
    %c0_i32 = arith.constant 0 : i32
    %c0_i32_0 = arith.constant 0 : i32
    %c0_i32_1 = arith.constant 0 : i32
    return %c0_i32, %c0_i32_0 : i32, i32
  }
  func.func @transform_2(%arg0: i32) -> (i32, i32, i32) {
    %c0_i32 = arith.constant 0 : i32
    %c0_i32_0 = arith.constant 0 : i32
    %c0_i32_1 = arith.constant 0 : i32
    %c0_i32_2 = arith.constant 0 : i32
    return %c0_i32, %c0_i32_0, %c0_i32_1 : i32, i32, i32
  }
  func.func @transform_3(%arg0: i32) -> (i32, i32) {
    %c0_i32 = arith.constant 0 : i32
    %c0_i32_0 = arith.constant 0 : i32
    %c0_i32_1 = arith.constant 0 : i32
    return %c0_i32, %c0_i32_0 : i32, i32
  }
}

</mosaic_0001>

<bundles_post_ra>
// kernel: tpu_custom_call.1
= control target key start
LH: loop header
LB: loop body
LE: loop exit
PB: predicated region body
PF: predicated region fallthrough
CT: control target
= control target key end

     0   :  { %8 = vsyncpa [#allocation3], 0  ;;  %s1139_s0 = inlined_call_operand.hbm [shape: s32[8,1,8], index: 0, kind: input, shape index: {}]   ;;  %s1140_s1 = inlined_call_operand.hbm [shape: f32[8,32], index: 1, kind: input, shape index: {}]   ;;  %s1141_s2 = inlined_call_operand.hbm [shape: bf16[3,8,8], index: 2, kind: input, shape index: {}]   ;;  %s1142_s3 = inlined_call_operand.hbm [shape: f32[1,2], index: 3, kind: output, shape index: {}]  }
   0x1   :  { %9 = vsyncpa [#allocation6], 0  ;;  %s29_s14 = sshll.u32 %s1140_s1, 4  ;;  %s30_s14 = int_to_ptr.hbm [resolvable:$true] %s29_s14 }
   0x2   :  { %10 = vsyncpa [#allocation4], 0  ;;  %s985_s15 = smov [#allocation5]   ;;  %s15_s19 = sshll.u32 %s1139_s0, 4  ;;  %s16_s19 = int_to_ptr.hbm [resolvable:$true] %s15_s19 }
   0x3   :  { %s31_s16 = sshll.u32 %s985_s15, 4  ;;  %s986_s20 = smov [#allocation2]   ;;  %s32_s16 = int_to_ptr.vmem [resolvable:$true] %s31_s16 }
   0x4   :  { %34 = dma.hbm_to_vmem [thread:$0]  %s30_s14, 128, %s32_s16, [#allocation6]  }
   0x5   :  { %s17_s21 = sshll.u32 %s986_s20, 4  ;;  %s987_s22 = smov 16   ;;  %s18_s21 = int_to_ptr.vmem [resolvable:$true] %s17_s21 }
   0x6   :  { %s988_s23 = smov 1   ;;  %s39_s1 = sshll.u32 %s1141_s2, 4  ;;  %s40_s1 = int_to_ptr.hbm [resolvable:$true] %s39_s1 }
   0x7   :  { %23 = dma.hbm_to_vmem [thread:$0]  %s16_s19, 128, %s18_s21, [#allocation3], %s987_s22, %s987_s22, %s988_s23  }
   0x8   :  { %s989_s26 = smov [#allocation7]   ;;  %s990_s28 = smov 64  }
   0x9   :  { %s41_s27 = sshll.u32 %s989_s26, 4  ;;  %s991_s29 = smov 4   ;;  %s42_s27 = int_to_ptr.vmem [resolvable:$true] %s41_s27 }
   0xa   :  { %47 = dma.hbm_to_vmem [thread:$0]  %s40_s1, 192, %s42_s27, [#allocation6], %s990_s28, %s990_s28, %s991_s29  }
   0xb   :  { %979 = dma.done.wait [#allocation3], 128  }
   0xc   :  { %980 = vsyncadd [#allocation3], 4294967168 }
   0xd   :  { %981 = dma.done.wait [#allocation6], 320  }
   0xe   :  { %982 = vsyncadd [#allocation6], 4294966976  ;;  %v77_v0 = vlaneseq  ;;  %v873_v5 = vld [vmem:[#allocation2] ss:$0 sm:$0xff]  ;;  %v874_v6 = vld [vmem:[#allocation2 + $0x1] ss:$0 sm:$0xff] }
   0xf   :  { %v875_v7 = vld [vmem:[#allocation2 + $0x2] ss:$0 sm:$0xff]  ;;  %v876_v8 = vld [vmem:[#allocation2 + $0x3] ss:$0 sm:$0xff]  ;;  %v992_v9 = vmov 1.0   ;;  %v178_v13 = vld [vmem:[#allocation5] sm:$0xff] }
  0x10   :  { %v1024_v1 = vshrl.u32 %v77_v0, 7  ;;  %v877_v10 = vld [vmem:[#allocation2 + $0x4] ss:$0 sm:$0xff]  ;;  %v878_v11 = vld [vmem:[#allocation2 + $0x5] ss:$0 sm:$0xff]  ;;  %s993_s0 = smov 126  }
  0x11   :  { %v879_v12 = vld [vmem:[#allocation2 + $0x6] ss:$0 sm:$0xff]  ;;  %v880_v14 = vld [vmem:[#allocation2 + $0x7] ss:$0 sm:$0xff]  ;;  %v353_v15 = vld [vmem:[#allocation7 + $0x4] sm:$0xf] }
  0x12   :  { %v1027_v2 = vadd.s32 24, %v1024_v1  ;;  %v1030_v3 = vadd.s32 16, %v1024_v1  ;;  %v1033_v4 = vadd.s32 8, %v1024_v1  ;;  %vm82_vm12 = vcmp.eq.s32.totalorder %v1024_v1, %v873_v5  ;;  %v351_v17 = vld [vmem:[#allocation7] sm:$0xf]  ;;  %s994_s2 = smov [#allocation8]  }
  0x13   :  { %vm86_vm13 = vcmp.eq.s32.totalorder %v1024_v1, %v874_v6  ;;  %vm90_vm14 = vcmp.eq.s32.totalorder %v1024_v1, %v875_v7  ;;  %vm94_vm15 = vcmp.eq.s32.totalorder %v1024_v1, %v876_v8  ;;  %v543_v32 = vld [vmem:[#allocation7 + $0x8] sm:$0xf]  ;;  %s762_s30 = sshll.u32 %s994_s2, 4  ;;  %s764_s6 = sshll.u32 %s1142_s3, 4  ;;  %s763_s30 = int_to_ptr.vmem [resolvable:$true] %s762_s30  ;;  %s765_s6 = int_to_ptr.hbm [resolvable:$true] %s764_s6 }
  0x14   :  { %vm85_vm0 = vcmp.eq.s32.totalorder %v1027_v2, %v873_v5  ;;  %vm84_vm1 = vcmp.eq.s32.totalorder %v1030_v3, %v873_v5  ;;  %vm89_vm2 = vcmp.eq.s32.totalorder %v1027_v2, %v874_v6  ;;  %vm93_vm3 = vcmp.eq.s32.totalorder %v1027_v2, %v875_v7 }
  0x15   :  { %807 = vmatpush.msk.msra.mxu0 %vm85_vm0, %v992_v9  ;;  %vm88_vm4 = vcmp.eq.s32.totalorder %v1030_v3, %v874_v6  ;;  %vm92_vm5 = vcmp.eq.s32.totalorder %v1030_v3, %v875_v7  ;;  %812 = vmatpush.msk.msra.mxu1 %vm89_vm2, %v992_v9  ;;  %vm97_vm6 = vcmp.eq.s32.totalorder %v1027_v2, %v876_v8  ;;  %vm179_vm0 = vcmask 261120  }
  0x16   :  { %817 = vmatpush.msk.msra.mxu2 %vm93_vm3, %v992_v9  ;;  %vm96_vm7 = vcmp.eq.s32.totalorder %v1030_v3, %v876_v8  ;;  %vm83_vm8 = vcmp.eq.s32.totalorder %v1033_v4, %v873_v5  ;;  %822 = vmatpush.msk.msra.mxu3 %vm97_vm6, %v992_v9  ;;  %vm87_vm9 = vcmp.eq.s32.totalorder %v1033_v4, %v874_v6 }
  0x17   :  { %808 = vmatpush.msk.msra.mxu0 %vm84_vm1, %v992_v9  ;;  %vm91_vm10 = vcmp.eq.s32.totalorder %v1033_v4, %v875_v7  ;;  %813 = vmatpush.msk.msra.mxu1 %vm88_vm4, %v992_v9  ;;  %vm95_vm11 = vcmp.eq.s32.totalorder %v1033_v4, %v876_v8  ;;  %vm101_vm1 = vcmp.eq.s32.totalorder %v1027_v2, %v877_v10 }
  0x18   :  { %818 = vmatpush.msk.msra.mxu2 %vm92_vm5, %v992_v9  ;;  %823 = vmatpush.msk.msra.mxu3 %vm96_vm7, %v992_v9  ;;  %vm105_vm2 = vcmp.eq.s32.totalorder %v1027_v2, %v878_v11  ;;  %vm109_vm3 = vcmp.eq.s32.totalorder %v1027_v2, %v879_v12  ;;  %vm113_vm4 = vcmp.eq.s32.totalorder %v1027_v2, %v880_v14 }
  0x19   :  { %809 = vmatpush.msk.msra.mxu0 %vm83_vm8, %v992_v9  ;;  %814 = vmatpush.msk.msra.mxu1 %vm87_vm9, %v992_v9  ;;  %vm100_vm5 = vcmp.eq.s32.totalorder %v1030_v3, %v877_v10  ;;  %vm104_vm6 = vcmp.eq.s32.totalorder %v1030_v3, %v878_v11  ;;  %vm108_vm7 = vcmp.eq.s32.totalorder %v1030_v3, %v879_v12 }
  0x1a   :  { %819 = vmatpush.msk.msra.mxu2 %vm91_vm10, %v992_v9  ;;  %824 = vmatpush.msk.msra.mxu3 %vm95_vm11, %v992_v9  ;;  %vm112_vm8 = vcmp.eq.s32.totalorder %v1030_v3, %v880_v14  ;;  %vm99_vm9 = vcmp.eq.s32.totalorder %v1033_v4, %v877_v10  ;;  %vm103_vm10 = vcmp.eq.s32.totalorder %v1033_v4, %v878_v11 }
  0x1b   :  { %810 = vmatpush.msk.msra.mxu0 %vm82_vm12, %v992_v9  ;;  %815 = vmatpush.msk.msra.mxu1 %vm86_vm13, %v992_v9  ;;  %vm107_vm11 = vcmp.eq.s32.totalorder %v1033_v4, %v879_v12  ;;  %vm111_vm12 = vcmp.eq.s32.totalorder %v1033_v4, %v880_v14  ;;  %vm98_vm13 = vcmp.eq.s32.totalorder %v1024_v1, %v877_v10 }
  0x1c   :  { %820 = vmatpush.msk.msra.mxu2 %vm90_vm14, %v992_v9  ;;  %825 = vmatpush.msk.msra.mxu3 %vm94_vm15, %v992_v9  ;;  %vm102_vm14 = vcmp.eq.s32.totalorder %v1024_v1, %v878_v11  ;;  %vm106_vm15 = vcmp.eq.s32.totalorder %v1024_v1, %v879_v12 }
  0x1d   :  { %811 = vmatmul.msk.f32.vlgmr.msra.gmra.mxu0 %vm179_vm0, %v178_v13  ;;  %816 = vmatmul.msk.f32.vlgmr.msra.gmra.mxu1 %vm179_vm0, %v178_v13 }
  0x1e   :  { %821 = vmatmul.msk.f32.vlgmr.msra.gmra.mxu2 %vm179_vm0, %v178_v13  ;;  %826 = vmatmul.msk.f32.vlgmr.msra.gmra.mxu3 %vm179_vm0, %v178_v13 }
  0x1f   :  { %827 = vmatpush.msk.msrb.mxu0 %vm101_vm1, %v992_v9  ;;  %832 = vmatpush.msk.msrb.mxu1 %vm105_vm2, %v992_v9  ;;  %vm110_vm1 = vcmp.eq.s32.totalorder %v1024_v1, %v880_v14  ;;  %vm370_vm2 = vcmask 1043456  }
  0x20   :  { %837 = vmatpush.msk.msrb.mxu2 %vm109_vm3, %v992_v9  ;;  %842 = vmatpush.msk.msrb.mxu3 %vm113_vm4, %v992_v9  ;;  %v372_v16 = vsel %vm370_vm2, %v353_v15, 0  ;;  %v478_v18 = vsel %vm370_vm2, %v351_v17, 0  ;;  %v549_v41 = vsel %vm370_vm2, %v543_v32, 0  ;;  %vm636_vm3 = vcmask 61440  }
  0x21   :  { %828 = vmatpush.msk.msrb.mxu0 %vm100_vm5, %v992_v9  ;;  %833 = vmatpush.msk.msrb.mxu1 %vm104_vm6, %v992_v9  ;;  %vm676_vm4 = vcmask 1041409   ;;  %vm712_vm5 = vcmask 1042434   ;;  %vm714_vm6 = vcmask 1043459  }
  0x22   :  { %838 = vmatpush.msk.msrb.mxu2 %vm108_vm7, %v992_v9  ;;  %843 = vmatpush.msk.msrb.mxu3 %vm112_vm8, %v992_v9 }
  0x23   :  { %829 = vmatpush.msk.msrb.mxu0 %vm99_vm9, %v992_v9  ;;  %834 = vmatpush.msk.msrb.mxu1 %vm103_vm10, %v992_v9  ;;  %vm755_vm10 = vcmask 8192  }
  0x24   :  { %839 = vmatpush.msk.msrb.mxu2 %vm107_vm11, %v992_v9  ;;  %844 = vmatpush.msk.msrb.mxu3 %vm111_vm12, %v992_v9 }
  0x25   :  { %830 = vmatpush.msk.msrb.mxu0 %vm98_vm13, %v992_v9  ;;  %835 = vmatpush.msk.msrb.mxu1 %vm102_vm14, %v992_v9 }
  0x26   :  { %840 = vmatpush.msk.msrb.mxu2 %vm106_vm15, %v992_v9  ;;  %845 = vmatpush.msk.msrb.mxu3 %vm110_vm1, %v992_v9 }
  0x27   :  { %831 = vmatmul.msk.f32.vlgmr.msrb.gmra.mxu0 %vm179_vm0, %v178_v13  ;;  %836 = vmatmul.msk.f32.vlgmr.msrb.gmra.mxu1 %vm179_vm0, %v178_v13 }
  0x28   :  { %841 = vmatmul.msk.f32.vlgmr.msrb.gmra.mxu2 %vm179_vm0, %v178_v13  ;;  %846 = vmatmul.msk.f32.vlgmr.msrb.gmra.mxu3 %vm179_vm0, %v178_v13  ;;  %vm366_vm0 = vcmask 64512  }
  0x29   :  { %381 = vmatpush.bf16.msra.mxu0 %v372_v16  ;;  %410 = vmatpush.bf16.msra.mxu1 %v372_v16 }
  0x2a   :  { %439 = vmatpush.bf16.msra.mxu2 %v372_v16  ;;  %468 = vmatpush.bf16.msra.mxu3 %v372_v16 }
  0x2d   :  { %487 = vmatpush.bf16.msrb.mxu0 %v478_v18  ;;  %503 = vmatpush.bf16.msrb.mxu1 %v478_v18 }
  0x2e   :  { %519 = vmatpush.bf16.msrb.mxu2 %v478_v18  ;;  %535 = vmatpush.bf16.msrb.mxu3 %v478_v18 }
  0x9a   :  { %v200_v19 = vpop.f32.mrf.mxu0  ;;  %v220_v21 = vpop.f32.mrf.mxu1 }
  0x9b   :  { %v343_v20 = vpack.c.bf16 %v200_v19, %v200_v19  ;;  %v344_v22 = vpack.c.bf16 %v220_v21, %v220_v21 }
  0x9d   :  { %v356_v23 = vunpack.c.l.b16 %v343_v20  ;;  %v357_v24 = vunpack.c.l.b16 %v344_v22 }
  0x9f   :  { %v358_v25 = vpack.c.b16 %v357_v24, %v356_v23 }
  0xa1   :  { %v240_v26 = vpop.f32.mrf.mxu2  ;;  %v360_v27 = vshrl.u32 %v358_v25, 16  ;;  %v362_v28 = vshll.u32 %v358_v25, 16  ;;  %v260_v30 = vpop.f32.mrf.mxu3  ;;  %v544_v1 = vrot.slane %v358_v25, 1 }
  0xa2   :  { %v345_v29 = vpack.c.bf16 %v240_v26, %v240_v26  ;;  %v346_v31 = vpack.c.bf16 %v260_v30, %v260_v30 }
  0xa3   :  { %v364_v33 = vrot.slane %v362_v28, 1 }
  0xa4   :  { %v390_v34 = vunpack.c.l.b16 %v345_v29  ;;  %v280_v35 = vpop.f32.mrf.mxu0  ;;  %v391_v36 = vunpack.c.l.b16 %v346_v31  ;;  %v300_v38 = vpop.f32.mrf.mxu1 }
  0xa5   :  { %v347_v37 = vpack.c.bf16 %v280_v35, %v280_v35  ;;  %v348_v39 = vpack.c.bf16 %v300_v38, %v300_v38  ;;  %v365_v40 = vor.u32 %v364_v33, %v360_v27 }
  0xa6   :  { %v392_v42 = vpack.c.b16 %v391_v36, %v390_v34 }
  0xa7   :  { %v419_v43 = vunpack.c.l.b16 %v347_v37  ;;  %v420_v44 = vunpack.c.l.b16 %v348_v39  ;;  %847 = vmatmul.msk.bf16.vlgmr.msra.gmra.mxu0 %vm366_vm0, %v365_v40 }
  0xa8   :  { %v396_v45 = vshll.u32 %v392_v42, 16  ;;  %558 = vmatpush.bf16.msra.mxu0 %v549_v41  ;;  %v394_v47 = vshrl.u32 %v392_v42, 16  ;;  %v565_v2 = vrot.slane %v392_v42, 1 }
  0xa9   :  { %v421_v46 = vpack.c.b16 %v420_v44, %v419_v43 }
  0xaa   :  { %v398_v48 = vrot.slane %v396_v45, 1 }
  0xab   :  { %v320_v49 = vpop.f32.mrf.mxu2  ;;  %v423_v50 = vshrl.u32 %v421_v46, 16  ;;  %v425_v51 = vshll.u32 %v421_v46, 16  ;;  %v340_v53 = vpop.f32.mrf.mxu3  ;;  %v583_v3 = vrot.slane %v421_v46, 1 }
  0xac   :  { %v349_v52 = vpack.c.bf16 %v320_v49, %v320_v49  ;;  %v350_v54 = vpack.c.bf16 %v340_v53, %v340_v53  ;;  %v399_v55 = vor.u32 %v398_v48, %v394_v47 }
  0xad   :  { %v427_v56 = vrot.slane %v425_v51, 1 }
  0xae   :  { %v448_v57 = vunpack.c.l.b16 %v349_v52  ;;  %v449_v58 = vunpack.c.l.b16 %v350_v54  ;;  %848 = vmatmul.msk.bf16.vlgmr.msra.gmra.mxu1 %vm366_vm0, %v399_v55 }
  0xaf   :  { %v428_v59 = vor.u32 %v427_v56, %v423_v50  ;;  %576 = vmatpush.bf16.msra.mxu1 %v549_v41 }
  0xb0   :  { %v450_v60 = vpack.c.b16 %v449_v58, %v448_v57 }
  0xb1   :  { %849 = vmatmul.msk.bf16.vlgmr.msra.gmra.mxu2 %vm366_vm0, %v428_v59 }
  0xb2   :  { %v454_v61 = vshll.u32 %v450_v60, 16  ;;  %594 = vmatpush.bf16.msra.mxu2 %v549_v41  ;;  %v452_v62 = vshrl.u32 %v450_v60, 16  ;;  %v601_v4 = vrot.slane %v450_v60, 1 }
  0xb4   :  { %v456_v63 = vrot.slane %v454_v61, 1 }
  0xb6   :  { %v457_v0 = vor.u32 %v456_v63, %v452_v62 }
  0xb7   :  { %851 = vmatmul.msk.bf16.vlgmr.msrb.gmra.mxu0 %vm366_vm0, %v358_v25 }
  0xb8   :  { %850 = vmatmul.msk.bf16.vlgmr.msra.gmra.mxu3 %vm366_vm0, %v457_v0 }
  0xb9   :  { %612 = vmatpush.bf16.msra.mxu3 %v549_v41 }
  0xbe   :  { %852 = vmatmul.msk.bf16.vlgmr.msrb.gmra.mxu1 %vm366_vm0, %v392_v42 }
  0xc1   :  { %853 = vmatmul.msk.bf16.vlgmr.msrb.gmra.mxu2 %vm366_vm0, %v421_v46 }
  0xc7   :  { %855 = vmatmul.msk.bf16.vlgmr.msra.gmra.mxu0 %vm366_vm0, %v544_v1 }
  0xc8   :  { %854 = vmatmul.msk.bf16.vlgmr.msrb.gmra.mxu3 %vm366_vm0, %v450_v60 }
  0xce   :  { %856 = vmatmul.msk.bf16.vlgmr.msra.gmra.mxu1 %vm366_vm0, %v565_v2 }
  0xd1   :  { %857 = vmatmul.msk.bf16.vlgmr.msra.gmra.mxu2 %vm366_vm0, %v583_v3 }
  0xd8   :  { %858 = vmatmul.msk.bf16.vlgmr.msra.gmra.mxu3 %vm366_vm0, %v601_v4 }
 0x124   :  { %v383_v5 = vpop.f32.mrf.mxu0 }
 0x12b   :  { %v412_v6 = vpop.f32.mrf.mxu1 }
 0x12c   :  { %v385_v7 = vpop.f32.mrf.mxu0 }
 0x133   :  { %v414_v8 = vpop.f32.mrf.mxu1 }
 0x134   :  { %v441_v10 = vpop.f32.mrf.mxu2  ;;  %v489_v11 = vpop.f32.mrf.mxu0 }
 0x135   :  { %v490_v25 = vadd.f32 %v489_v11, %v383_v5 }
 0x13b   :  { %v470_v12 = vpop.f32.mrf.mxu3  ;;  %v505_v13 = vpop.f32.mrf.mxu1 }
 0x13c   :  { %v443_v14 = vpop.f32.mrf.mxu2  ;;  %v491_v15 = vpop.f32.mrf.mxu0  ;;  %v506_v26 = vadd.f32 %v505_v13, %v412_v6 }
 0x13d   :  { %v492_v22 = vadd.f32 %v491_v15, %v385_v7 }
 0x143   :  { %v472_v16 = vpop.f32.mrf.mxu3  ;;  %v507_v17 = vpop.f32.mrf.mxu1 }
 0x144   :  { %v521_v18 = vpop.f32.mrf.mxu2  ;;  %v560_v19 = vpop.f32.mrf.mxu0  ;;  %v508_v30 = vadd.f32 %v507_v17, %v414_v8 }
 0x145   :  { %v619_v28 = vadd.f32 %v560_v19, %v490_v25  ;;  %v522_v40 = vadd.f32 %v521_v18, %v441_v10 }
 0x147   :  { %v627_v34 = vmax.f32 %v619_v28, 0.0 }
 0x149   :  { %v635_v41 = vsel %vm366_vm0, %v627_v34, -inf }
 0x14b   :  { %v537_v20 = vpop.f32.mrf.mxu3  ;;  %v578_v21 = vpop.f32.mrf.mxu1 }
 0x14c   :  { %v523_v23 = vpop.f32.mrf.mxu2  ;;  %v562_v24 = vpop.f32.mrf.mxu0  ;;  %v621_v29 = vadd.f32 %v578_v21, %v506_v26  ;;  %v538_v54 = vadd.f32 %v537_v20, %v470_v12 }
 0x14d   :  { %v620_v27 = vadd.f32 %v562_v24, %v492_v22  ;;  %v524_v47 = vadd.f32 %v523_v23, %v443_v14 }
 0x14e   :  { %v629_v35 = vmax.f32 %v621_v29, 0.0 }
 0x14f   :  { %v628_v31 = vmax.f32 %v620_v27, 0.0 }
 0x150   :  { %v645_v42 = vsel %vm366_vm0, %v629_v35, -inf }
 0x151   :  { %v637_v38 = vsel %vm636_vm3, %v628_v31, -inf }
 0x152   :  { %v638_v44 = vmax.f32 %v635_v41, %v637_v38 }
 0x153   :  { %v539_v32 = vpop.f32.mrf.mxu3  ;;  %v580_v33 = vpop.f32.mrf.mxu1 }
 0x154   :  { %v622_v36 = vadd.f32 %v580_v33, %v508_v30  ;;  %v596_v37 = vpop.f32.mrf.mxu2  ;;  %v639_v51 = vrot.slane %v638_v44, 4  ;;  %v540_v61 = vadd.f32 %v539_v32, %v472_v16 }
 0x155   :  { %v623_v46 = vadd.f32 %v596_v37, %v522_v40 }
 0x156   :  { %v630_v39 = vmax.f32 %v622_v36, 0.0  ;;  %v640_v58 = vmax.f32 %v638_v44, %v639_v51 }
 0x157   :  { %v631_v52 = vmax.f32 %v623_v46, 0.0 }
 0x158   :  { %v646_v43 = vsel %vm636_vm3, %v630_v39, -inf  ;;  %v641_v4 = vrot.slane %v640_v58, 2 }
 0x159   :  { %v647_v45 = vmax.f32 %v645_v42, %v646_v43  ;;  %v654_v59 = vsel %vm366_vm0, %v631_v52, -inf }
 0x15a   :  { %v642_v12 = vmax.f32 %v640_v58, %v641_v4 }
 0x15b   :  { %v648_v48 = vrot.slane %v647_v45, 4  ;;  %v614_v49 = vpop.f32.mrf.mxu3 }
 0x15c   :  { %v598_v50 = vpop.f32.mrf.mxu2  ;;  %v625_v57 = vadd.f32 %v614_v49, %v538_v54  ;;  %v643_v18 = vrot.slane %v642_v12, 1 }
 0x15d   :  { %v624_v53 = vadd.f32 %v598_v50, %v524_v47  ;;  %v649_v55 = vmax.f32 %v647_v45, %v648_v48 }
 0x15e   :  { %v633_v1 = vmax.f32 %v625_v57, 0.0  ;;  %v644_v23 = vmax.f32 %v642_v12, %v643_v18 }
 0x15f   :  { %v632_v56 = vmax.f32 %v624_v53, 0.0  ;;  %v650_v63 = vrot.slane %v649_v55, 2 }
 0x160   :  { %v663_v8 = vsel %vm366_vm0, %v633_v1, -inf  ;;  %v703_v28 = vmul.f32 %v644_v23, %v644_v23 }
 0x161   :  { %v655_v60 = vsel %vm636_vm3, %v632_v56, -inf  ;;  %v651_v7 = vmax.f32 %v649_v55, %v650_v63 }
 0x162   :  { %v656_v62 = vmax.f32 %v654_v59, %v655_v60 }
 0x163   :  { %v616_v0 = vpop.f32.mrf.mxu3  ;;  %v652_v15 = vrot.slane %v651_v7, 1 }
 0x164   :  { %v657_v2 = vrot.slane %v656_v62, 4  ;;  %v626_v3 = vadd.f32 %v616_v0, %v540_v61 }
 0x165   :  { %v653_v20 = vmax.f32 %v651_v7, %v652_v15 }
 0x166   :  { %v658_v5 = vmax.f32 %v656_v62, %v657_v2  ;;  %v634_v6 = vmax.f32 %v626_v3, 0.0 }
 0x167   :  { %v704_v25 = vmul.f32 %v653_v20, %v653_v20 }
 0x168   :  { %v659_v10 = vrot.slane %v658_v5, 2  ;;  %v664_v11 = vsel %vm636_vm3, %v634_v6, -inf }
 0x169   :  { %v665_v13 = vmax.f32 %v663_v8, %v664_v11  ;;  %v711_v33 = vsel %vm676_vm4, %v704_v25, %v703_v28 }
 0x16a   :  { %v660_v14 = vmax.f32 %v658_v5, %v659_v10 }
 0x16b   :  { %v666_v16 = vrot.slane %v665_v13, 4 }
 0x16c   :  { %v661_v17 = vrot.slane %v660_v14, 1 }
 0x16d   :  { %v667_v19 = vmax.f32 %v665_v13, %v666_v16 }
 0x16e   :  { %v662_v22 = vmax.f32 %v660_v14, %v661_v17 }
 0x16f   :  { %v668_v21 = vrot.slane %v667_v19, 2 }
 0x170   :  { %v705_v27 = vmul.f32 %v662_v22, %v662_v22  ;;  %v672_v30 = vmul.f32 %v662_v22, %v644_v23 }
 0x171   :  { %v669_v24 = vmax.f32 %v667_v19, %v668_v21 }
 0x172   :  { %v713_v34 = vsel %vm712_vm5, %v705_v27, %v711_v33 }
 0x173   :  { %v670_v26 = vrot.slane %v669_v24, 1 }
 0x175   :  { %v671_v29 = vmax.f32 %v669_v24, %v670_v26 }
 0x177   :  { %v673_v31 = vmul.f32 %v671_v29, %v653_v20  ;;  %v706_v32 = vmul.f32 %v671_v29, %v671_v29 }
 0x179   :  { %v677_v35 = vsel %vm676_vm4, %v673_v31, %v672_v30  ;;  %v715_v36 = vsel %vm714_vm6, %v706_v32, %v713_v34 }
 0x17a   :  { %859 = vmatpush.xpose.msk.msrb.mxu0 %vm366_vm0, %v677_v35  ;;  %861 = vmatpush.xpose.msk.msrb.mxu1 %vm366_vm0, %v715_v36 }
 0x17d   :  { %862 = vmatmul.msk.f32.vlgmr.msrb.gmra.mxu1 %vm366_vm0, %v992_v9  ;;  %860 = vmatmul.msk.f32.vlgmr.msrb.gmra.mxu0 %vm366_vm0, %v992_v9 }
 0x1fa   :  { %v735_v37 = vpop.f32.mrf.mxu1  ;;  %v700_v46 = vpop.f32.mrf.mxu0 }
 0x1fb   :  { %v738_v38 = vmax.f32 %v735_v37, 1e-16 }
 0x1fd   :  { %881 = vrsqrt.f32 %v738_v38  ;;  %vm745_vm8 = vweird.f32 %v738_v38 }
 0x203   :  { %v882_v39 = vpop.eup %881 }
 0x204   :  { %v740_v40 = vmul.f32 %v882_v39, %v738_v38  ;;  %vm746_vm7 = vweird.f32 %v882_v39 }
 0x205   :  { %vm747_vm9 = vmor %vm745_vm8, %vm746_vm7 }
 0x206   :  { %v741_v41 = vmul.f32 %v882_v39, %v740_v40 }
 0x208   :  { %v742_v42 = vmul.f32 0.5, %v741_v41 }
 0x20a   :  { %v743_v43 = vsub.f32 1.5, %v742_v42 }
 0x20c   :  { %v744_v44 = vmul.f32 %v882_v39, %v743_v43 }
 0x20e   :  { %v748_v45 = vsel %vm747_vm9, %v882_v39, %v744_v44 }
 0x20f   :  { %751 = vrot.lane.b32.xlu0 %v748_v45, %s993_s0  ;;  %v749_v9 = vmul.f32 %v748_v45, %v700_v46 }
 0x281   :  { %v752_v47 = vpop.permute.xlu0 %751 }
 0x282   :  { %v754_v48 = vmul.f32 %v752_v47, %v749_v9 }
 0x284   :  { %756 = vst.msk [vmem:[#allocation8] sm:$0x1] %vm755_vm10, %v754_v48 }
 0x285   :  { %767 = dma.vmem_to_hbm [thread:$0]  %s763_s30, 16, %s765_s6, [#allocation4]  }
 0x286   :  { %983 = dma.done.wait [#allocation4], 16  }
 0x287   :  { %984 = vsyncadd [#allocation4], 4294967280 }
 0x288   :  { %772 = vsyncpa [#allocation3], 1 }
 0x289   :  { %773 = vsyncpa [#allocation6], 1 }
 0x28a   :  { %774 = vsyncpa [#allocation4], 1 }

</bundles_post_ra>
